<compile_context>
chip_gen: v6e
topology: v6e:2x2x1
jax: 0.10.0
libtpu: 0.0.40
codegen_flags: <defaults>
</compile_context>

<pallas_src>
import functools

import jax
import jax.numpy as jnp
from jax.experimental import pallas as pl
from jax.experimental.pallas import tpu as pltpu


# ---------------------------------------------------------------------------
# Kernel: two dense matmuls + bias + ReLU on a (tb, D*D) batch tile.
# ---------------------------------------------------------------------------
def _sae_kernel(
    x_ref,      # (tb, D*D)  f32 (cast to compute dtype in-kernel)
    we_ref,     # (D*D, L*L) compute_dtype   fused encoder weight (transposed)
    be_ref,     # (1,   L*L) f32             fused encoder bias
    wd_ref,     # (L*L, D*D) compute_dtype   fused decoder weight (transposed)
    bd_ref,     # (1,   D*D) f32             fused decoder bias
    recon_ref,  # (tb, D*D)  out_dtype
    z_ref,      # (tb, L*L)  out_dtype
):
    # In-kernel downcast (no-op when compute dtype is f32): keeps x to a single
    # f32 HBM read with no wrapper-side cast pass.
    x = x_ref[...].astype(we_ref.dtype)

    # Encoder: single MXU matmul, f32 accumulate, bias + ReLU on the VPU.
    z = jnp.dot(x, we_ref[...], preferred_element_type=jnp.float32)
    z = jnp.maximum(z + be_ref[...], 0.0)
    z_ref[...] = z.astype(z_ref.dtype)

    # Decoder: single MXU matmul (cast z back to the matmul dtype), f32 accumulate.
    r = jnp.dot(z.astype(wd_ref.dtype), wd_ref[...],
                preferred_element_type=jnp.float32)
    recon_ref[...] = (r + bd_ref[...]).astype(recon_ref.dtype)


# ---------------------------------------------------------------------------
# Wrapper-side fusion of a 2-mode NdLinear into one dense layer.
# ---------------------------------------------------------------------------
def _fuse_ndlinear(w1, b1, w2, b2):
    """Fold mode-1 linear (w1: (H1,I1), b1: (H1,)) followed by mode-2 linear
    (w2: (H2,I2), b2: (H2,)) into a single dense layer on the row-major
    flattened tensor:  y_flat = x_flat @ W_T + bias_row.

    y[b, h1*H2 + h2] = sum_{i1,i2} w1[h1,i1] * w2[h2,i2] * x[b, i1*I2 + i2]
                       + b1[h1] * sum_{i2} w2[h2,i2] + b2[h2]
    """
    W = jnp.kron(w1, w2)                                           # (H1*H2, I1*I2)
    bias = jnp.kron(b1, jnp.sum(w2, axis=1)) + jnp.tile(b2, w1.shape[0])
    return W.T, bias[None, :].astype(jnp.float32)                  # (I1*I2, H1*H2), (1, H1*H2)


# ---------------------------------------------------------------------------
# Forward pass.
# ---------------------------------------------------------------------------
@functools.partial(
    jax.jit,
    static_argnames=("dim1", "latent_dim1", "tb", "compute_dtype", "out_dtype"))
def sae_ndlinear_forward(x, params, *, dim1, latent_dim1, tb=4096,
                         compute_dtype=jnp.float32, out_dtype=jnp.float32):
    """x: (B, input_dim) float32.  Returns (recon (B, input_dim), z (B, L, L)).

    tb: batch tile (rows per grid step).  Large tiles amortize the ~0.35us
    per-step overhead; 4096 rows is ~18 MiB of double-buffered tiles, inside
    v7x's 32 MiB scoped-VMEM cap and trivially inside v5e/v6e's 128 MiB.
    compute_dtype: MXU input dtype (bf16 recommended on v6e/v7x); accumulation
    stays f32 either way.
    out_dtype: dtype of recon/z write-back (bf16 halves output HBM traffic).
    """
    B, input_dim = x.shape
    D, L = dim1, latent_dim1
    DD, LL = D * D, L * L
    assert input_dim == DD

    ew1, eb1, ew2, eb2, dw1, db1, dw2, db2 = params
    we_t, be = _fuse_ndlinear(ew1, eb1, ew2, eb2)   # (DD, LL), (1, LL)
    wd_t, bd = _fuse_ndlinear(dw1, db1, dw2, db2)   # (LL, DD), (1, DD)
    we_t = we_t.astype(compute_dtype)
    wd_t = wd_t.astype(compute_dtype)
    # NOTE: x is deliberately NOT cast here -- the kernel casts it on the VPU.

    # --- batch tile selection ------------------------------------------------
    bf16ish = (jnp.dtype(compute_dtype).itemsize == 2
               or jnp.dtype(out_dtype).itemsize == 2)
    sub = 16 if bf16ish else 8                      # packed-sublane granularity
    tb = max(sub, min(int(tb), pl.cdiv(B, sub) * sub))
    tb = (tb // sub) * sub
    grid = (pl.cdiv(B, tb),)
    # No jnp.pad of x: Pallas handles the partial last block (OOB input rows
    # are undefined but never mix across rows; OOB output rows are dropped).

    # --- VMEM budget (generation-aware cap) ----------------------------------
    in_item = x.dtype.itemsize
    cd_item = jnp.dtype(compute_dtype).itemsize
    out_item = jnp.dtype(out_dtype).itemsize
    work_bytes = (2 * tb * DD * in_item             # x tile   (double-buffered)
                  + 2 * tb * DD * out_item          # recon    (double-buffered)
                  + 2 * tb * LL * out_item          # z        (double-buffered)
                  + 2 * DD * LL * cd_item           # resident fused weights
                  + 4 * (DD + LL))                  # resident fused biases (f32)
    try:
        vmem_cap = pltpu.get_tpu_info().vmem_capacity_bytes
    except Exception:
        vmem_cap = 64 << 20                         # assume v7x-sized if query fails
    vmem_cap_half = vmem_cap // 2                   # 32 MiB on v7x, 64 MiB on 128-MiB parts
    vmem_limit = int(min(max(work_bytes + (4 << 20), 16 << 20), vmem_cap_half))

    # --- cost hint for the surrounding XLA schedule ---------------------------
    flops = 4 * B * DD * LL                         # encoder + decoder matmuls
    bytes_accessed = (B * DD * in_item + B * DD * out_item + B * LL * out_item
                      + 2 * DD * LL * cd_item + 4 * (DD + LL))
    cost = pl.CostEstimate(flops=flops, transcendentals=0,
                           bytes_accessed=bytes_accessed)

    recon, z_flat = pl.pallas_call(
        _sae_kernel,
        out_shape=(
            jax.ShapeDtypeStruct((B, DD), out_dtype),
            jax.ShapeDtypeStruct((B, LL), out_dtype),
        ),
        grid_spec=pltpu.PrefetchScalarGridSpec(
            num_scalar_prefetch=0,
            grid=grid,
            in_specs=[
                pl.BlockSpec((tb, DD), lambda b: (b, 0)),   # x tile (lane-dense)
                pl.BlockSpec((DD, LL), lambda b: (0, 0)),   # fused encoder W^T
                pl.BlockSpec((1, LL), lambda b: (0, 0)),    # fused encoder bias
                pl.BlockSpec((LL, DD), lambda b: (0, 0)),   # fused decoder W^T
                pl.BlockSpec((1, DD), lambda b: (0, 0)),    # fused decoder bias
            ],
            out_specs=[
                pl.BlockSpec((tb, DD), lambda b: (b, 0)),   # recon (lane-dense)
                pl.BlockSpec((tb, LL), lambda b: (b, 0)),   # z (flattened)
            ],
        ),
        compiler_params=pltpu.CompilerParams(
            dimension_semantics=("parallel",),
            vmem_limit_bytes=vmem_limit,
        ),
        cost_estimate=cost,
    )(x, we_t, be, wd_t, bd)

    # Module return shapes: recon (B, D*D) == torch .view(B, -1); z (B, L, L).
    return recon, z_flat.reshape(B, L, L)


# ---------------------------------------------------------------------------
# Pure-JAX reference mirroring torch NdLinear semantics (mode-1 then mode-2).
# ---------------------------------------------------------------------------
def _reference(x, params, dim1, latent_dim1):
    B = x.shape[0]
    D, L = dim1, latent_dim1
    ew1, eb1, ew2, eb2, dw1, db1, dw2, db2 = params
    X = x.reshape(B, D, D)
    z1 = jnp.einsum("hi,bij->bhj", ew1, X) + eb1[None, :, None]
    z2 = jnp.einsum("bhj,kj->bhk", z1, ew2) + eb2[None, None, :]
    z = jnp.maximum(z2, 0.0)
    r1 = jnp.einsum("hi,bij->bhj", dw1, z) + db1[None, :, None]
    r2 = jnp.einsum("bhj,kj->bhk", r1, dw2) + db2[None, None, :]
    return r2.reshape(B, D * D), z


if __name__ == "__main__":
    # Module config: input_dim must be a perfect square (torch .view requires it).
    # hidden_dim is accepted by __init__ but unused in forward.
    input_dim, hidden_dim, latent_dim = 256, 32, 64
    dim1 = int(input_dim ** 0.5)          # 16
    latent_dim1 = int(latent_dim ** 0.5)  # 8
    B = 16

    key = jax.random.PRNGKey(0)
    ks = jax.random.split(key, 9)
    f32 = jnp.float32
    scale_e = 1.0 / jnp.sqrt(f32(dim1))
    scale_d = 1.0 / jnp.sqrt(f32(latent_dim1))

    # nn.Linear-style params: weight (out, in), bias (out,).
    params = (
        jax.random.normal(ks[0], (latent_dim1, dim1), f32) * scale_e,   # enc mode-1 W
        jax.random.normal(ks[1], (latent_dim1,), f32) * 0.1,            # enc mode-1 b
        jax.random.normal(ks[2], (latent_dim1, dim1), f32) * scale_e,   # enc mode-2 W
        jax.random.normal(ks[3], (latent_dim1,), f32) * 0.1,            # enc mode-2 b
        jax.random.normal(ks[4], (dim1, latent_dim1), f32) * scale_d,   # dec mode-1 W
        jax.random.normal(ks[5], (dim1,), f32) * 0.1,                   # dec mode-1 b
        jax.random.normal(ks[6], (dim1, latent_dim1), f32) * scale_d,   # dec mode-2 W
        jax.random.normal(ks[7], (dim1,), f32) * 0.1,                   # dec mode-2 b
    )
    x = jax.random.normal(ks[8], (B, input_dim), f32)

    recon_ref, z_ref = _reference(x, params, dim1, latent_dim1)

    # f32 path (tight tolerance vs reference); tb=8 -> grid of 2 steps.
    recon, z = sae_ndlinear_forward(x, params, dim1=dim1, latent_dim1=latent_dim1,
                                    tb=8, compute_dtype=jnp.float32)
    jax.block_until_ready((recon, z))
    assert recon.shape == (B, input_dim) and z.shape == (B, latent_dim1, latent_dim1)
    assert jnp.allclose(recon, recon_ref, atol=1e-4, rtol=1e-4)
    assert jnp.allclose(z, z_ref, atol=1e-4, rtol=1e-4)

    # bf16 matmuls (in-kernel cast of x) / f32 accumulate / f32 outputs.
    recon_b, z_b = sae_ndlinear_forward(x, params, dim1=dim1, latent_dim1=latent_dim1,
                                        tb=8, compute_dtype=jnp.bfloat16)
    jax.block_until_ready((recon_b, z_b))
    assert jnp.allclose(recon_b, recon_ref, atol=5e-2, rtol=5e-2)
    assert jnp.allclose(z_b, z_ref, atol=5e-2, rtol=5e-2)

    # Full low-traffic config: bf16 matmuls AND bf16 write-back (f32 accumulate).
    recon_c, z_c = sae_ndlinear_forward(x, params, dim1=dim1, latent_dim1=latent_dim1,
                                        tb=8, compute_dtype=jnp.bfloat16,
                                        out_dtype=jnp.bfloat16)
    jax.block_until_ready((recon_c, z_c))
    assert recon_c.dtype == jnp.bfloat16 and z_c.dtype == jnp.bfloat16
    assert recon_c.shape == (B, input_dim) and z_c.shape == (B, latent_dim1, latent_dim1)
    assert jnp.allclose(recon_c.astype(f32), recon_ref, atol=1e-1, rtol=1e-1)
    assert jnp.allclose(z_c.astype(f32), z_ref, atol=1e-1, rtol=1e-1)

    print("KERNEL_OK")
</pallas_src>

<mosaic_0001>
module attributes {stable_mosaic.version = 11 : i64} {
  func.func @_sae_kernel(%arg0: i32, %arg1: memref<8x256xf32, #tpu.memory_space<vmem>>, %arg2: memref<256x64xf32, #tpu.memory_space<vmem>>, %arg3: memref<1x64xf32, #tpu.memory_space<vmem>>, %arg4: memref<64x256xf32, #tpu.memory_space<vmem>>, %arg5: memref<1x256xf32, #tpu.memory_space<vmem>>, %arg6: memref<8x256xf32, #tpu.memory_space<vmem>>, %arg7: memref<8x64xf32, #tpu.memory_space<vmem>>) attributes {dimension_semantics = [#tpu.dimension_semantics<parallel>], iteration_bounds = array<i64: 2>, scalar_prefetch = 0 : i64, scratch_operands = 0 : i64, tpu.core_type = #tpu.core_type<tc>, window_params = [{transform_indices = @transform_0, window_bounds = array<i64: 8, 256>}, {pipeline_mode = #tpu.pipeline_mode<synchronous>, transform_indices = @transform_1, window_bounds = array<i64: 256, 64>}, {pipeline_mode = #tpu.pipeline_mode<synchronous>, transform_indices = @transform_2, window_bounds = array<i64: 1, 64>}, {pipeline_mode = #tpu.pipeline_mode<synchronous>, transform_indices = @transform_3, window_bounds = array<i64: 64, 256>}, {pipeline_mode = #tpu.pipeline_mode<synchronous>, transform_indices = @transform_4, window_bounds = array<i64: 1, 256>}, {transform_indices = @transform_5, window_bounds = array<i64: 8, 256>}, {transform_indices = @transform_6, window_bounds = array<i64: 8, 64>}]} {
    %c0 = arith.constant 0 : index
    %c0_0 = arith.constant 0 : index
    %0 = vector.load %arg1[%c0, %c0_0] : memref<8x256xf32, #tpu.memory_space<vmem>>, vector<8x256xf32>
    %c0_1 = arith.constant 0 : index
    %c0_2 = arith.constant 0 : index
    %1 = vector.load %arg2[%c0_1, %c0_2] : memref<256x64xf32, #tpu.memory_space<vmem>>, vector<256x64xf32>
    %cst = arith.constant dense<0.000000e+00> : vector<8x64xf32>
    %2 = tpu.matmul %0, %1, %cst {dimension_numbers = #tpu.dot_dimension_numbers<[1], [0], [0], [1], [0, 0, 1, 1], [], []>} : vector<8x256xf32>, vector<256x64xf32>, vector<8x64xf32> -> vector<8x64xf32>
    %c0_3 = arith.constant 0 : index
    %c0_4 = arith.constant 0 : index
    %3 = vector.load %arg3[%c0_3, %c0_4] : memref<1x64xf32, #tpu.memory_space<vmem>>, vector<1x64xf32>
    %4 = vector.broadcast %3 : vector<1x64xf32> to vector<8x64xf32>
    %5 = arith.addf %2, %4 : vector<8x64xf32>
    %cst_5 = arith.constant 0.000000e+00 : f32
    %6 = vector.broadcast %cst_5 : f32 to vector<8x64xf32>
    %7 = arith.maximumf %5, %6 : vector<8x64xf32>
    %c0_6 = arith.constant 0 : index
    %c0_7 = arith.constant 0 : index
    %8 = vector.load %arg7[%c0_6, %c0_7] : memref<8x64xf32, #tpu.memory_space<vmem>>, vector<8x64xf32>
    tpu.vector_store %arg7[%c0_6, %c0_7], %7 {strides = array<i32>} : memref<8x64xf32, #tpu.memory_space<vmem>>, vector<8x64xf32>,
    %c0_8 = arith.constant 0 : index
    %c0_9 = arith.constant 0 : index
    %9 = vector.load %arg4[%c0_8, %c0_9] : memref<64x256xf32, #tpu.memory_space<vmem>>, vector<64x256xf32>
    %cst_10 = arith.constant dense<0.000000e+00> : vector<8x256xf32>
    %10 = tpu.matmul %7, %9, %cst_10 {dimension_numbers = #tpu.dot_dimension_numbers<[1], [0], [0], [1], [0, 0, 1, 1], [], []>} : vector<8x64xf32>, vector<64x256xf32>, vector<8x256xf32> -> vector<8x256xf32>
    %c0_11 = arith.constant 0 : index
    %c0_12 = arith.constant 0 : index
    %11 = vector.load %arg5[%c0_11, %c0_12] : memref<1x256xf32, #tpu.memory_space<vmem>>, vector<1x256xf32>
    %12 = vector.broadcast %11 : vector<1x256xf32> to vector<8x256xf32>
    %13 = arith.addf %10, %12 : vector<8x256xf32>
    %c0_13 = arith.constant 0 : index
    %c0_14 = arith.constant 0 : index
    %14 = vector.load %arg6[%c0_13, %c0_14] : memref<8x256xf32, #tpu.memory_space<vmem>>, vector<8x256xf32>
    tpu.vector_store %arg6[%c0_13, %c0_14], %13 {strides = array<i32>} : memref<8x256xf32, #tpu.memory_space<vmem>>, vector<8x256xf32>,
    return
  }
  func.func @transform_0(%arg0: i32) -> (i32, i32) {
    %c0_i32 = arith.constant 0 : i32
    %c0_i32_0 = arith.constant 0 : i32
    return %arg0, %c0_i32 : i32, i32
  }
  func.func @transform_1(%arg0: i32) -> (i32, i32) {
    %c0_i32 = arith.constant 0 : i32
    %c0_i32_0 = arith.constant 0 : i32
    %c0_i32_1 = arith.constant 0 : i32
    return %c0_i32, %c0_i32_0 : i32, i32
  }
  func.func @transform_2(%arg0: i32) -> (i32, i32) {
    %c0_i32 = arith.constant 0 : i32
    %c0_i32_0 = arith.constant 0 : i32
    %c0_i32_1 = arith.constant 0 : i32
    return %c0_i32, %c0_i32_0 : i32, i32
  }
  func.func @transform_3(%arg0: i32) -> (i32, i32) {
    %c0_i32 = arith.constant 0 : i32
    %c0_i32_0 = arith.constant 0 : i32
    %c0_i32_1 = arith.constant 0 : i32
    return %c0_i32, %c0_i32_0 : i32, i32
  }
  func.func @transform_4(%arg0: i32) -> (i32, i32) {
    %c0_i32 = arith.constant 0 : i32
    %c0_i32_0 = arith.constant 0 : i32
    %c0_i32_1 = arith.constant 0 : i32
    return %c0_i32, %c0_i32_0 : i32, i32
  }
  func.func @transform_5(%arg0: i32) -> (i32, i32) {
    %c0_i32 = arith.constant 0 : i32
    %c0_i32_0 = arith.constant 0 : i32
    return %arg0, %c0_i32 : i32, i32
  }
  func.func @transform_6(%arg0: i32) -> (i32, i32) {
    %c0_i32 = arith.constant 0 : i32
    %c0_i32_0 = arith.constant 0 : i32
    return %arg0, %c0_i32 : i32, i32
  }
}

</mosaic_0001>

<bundles_post_ra>
// kernel: sae_ndlinear_forward.1
= control target key start
LH: loop header
LB: loop body
LE: loop exit
PB: predicated region body
PF: predicated region fallthrough
CT: control target
= control target key end

     0   :  { %12 = vsyncpa [#allocation3], 0  ;;  %s1023_s0 = inlined_call_operand.vmem [shape: f32[16,256], index: 0, kind: input, shape index: {}]   ;;  %s1024_s1 = inlined_call_operand.vmem [shape: f32[256,64], index: 1, kind: input, shape index: {}]   ;;  %s1025_s2 = inlined_call_operand.vmem [shape: f32[1,64], index: 2, kind: input, shape index: {}]   ;;  %s1026_s3 = inlined_call_operand.vmem [shape: f32[64,256], index: 3, kind: input, shape index: {}]   ;;  %s1027_s4 = inlined_call_operand.vmem [shape: f32[1,256], index: 4, kind: input, shape index: {}]   ;;  %s1028_s5 = inlined_call_operand.hbm [shape: f32[16,256], index: 5, kind: output, shape index: {0}]   ;;  %s1029_s6 = inlined_call_operand.vmem [shape: f32[16,64], index: 6, kind: output, shape index: {1}]  }
   0x1   :  { %14 = vsyncpa [#allocation3 + $0x1], 0  ;;  %s775_s21 = smov 0   ;;  %s777_s22 = smov 0  }
   0x2   :  { %s779_s23 = smov 0   ;;  %s781_s24 = smov 0  }
   0x3 LB: > { %s796_s25 = sadd.s32 4294967295, %s736_s24   ;;  %s584_s26 = sadd.s32 4294967294, %s736_s24   ;;  %s736_s24 = sphi %s781_s24, %s1035_s24   ;;  %s732_s23 = sphi %s779_s23, %s1034_s23   ;;  %s728_s22 = sphi %s777_s22, %s1033_s22   ;;  %s724_s21 = sphi %s775_s21, %s1032_s21  }
   0x4   : > { %s800_s27 = sadd.s32 1, %s736_s24   ;;  %s137_s28 = sadd.s32 1, %s732_s23 }
   0x5   : > { %s134_s29 = ssub.s32 %s736_s24, %s800_s27  ;;  %p147_p0 = scmp.ne.s32.totalorder %s732_s23, %s728_s22 }
   0x6   : > { %p135_p1 = scmp.eq.s32.totalorder %s134_s29, 0  ;;  %p148_p2 = scmp.eq.s32.totalorder %s796_s25, 1 }
   0x7   : > { %p153_p3 = scmp.ne.s32.totalorder %s728_s22, %s724_s21  ;;  %p154_p4 = scmp.eq.s32.totalorder %s584_s26, 1 }
   0x8   : > { %s811_s30 = scalar_select %p135_p1, %s732_s23, %s137_s28  }
   0x9   : > { %p813_p5 = por %p148_p2, %p147_p0  ;;  %p817_p6 = por %p154_p4, %p153_p3 }
   0xa   : > { %p587_p7 = scmp.ge.s32.totalorder %s736_s24, 1  ;;  %p218_p8 = scmp.lt.s32.totalorder %s736_s24, 3 }
   0xc   : > { %p219_p9 = pnand %p587_p7, %p218_p8 }
   0xd   : > { %p252_p10 = scmp.lt.s32.totalorder (!%p219_p9), %s796_s25, 1  ;;  %s243_s28 = sand.u32 (!%p219_p9), 1, %s728_s22  }
   0xe   : > { %222 = sbr.rel (%p219_p9) target bundleno = 463 (0x1cf), region = 40  ;;  %s588_s29 = sshll.u32 (!%p219_p9), %s243_s28, 4 }
   0xf   : > { %s480_s16 = scalar_lea.sflag (!%p219_p9), [#allocation3], %s243_s28 }
  0x13   : > { %v294_v0 = vld [vmem:[%s1024_s1 + $0xf8] sm:$0xff]  ;;  %v293_v2 = vld [vmem:[%s1024_s1 + $0xf0] sm:$0xff]  ;;  %v292_v4 = vld [vmem:[%s1024_s1 + $0xe8] sm:$0xff]  ;;  %s840_s19 = scalar_select %p252_p10, %s796_s25, 1  ;;  %v738_v50 = vmov 0.0   ;;  %vm373_vm0 = vcmask 523264   ;;  %v393_v57 = vlaneseq }
  0x14   : > { %v278_v1 = vld [vmem:[%s1024_s1 + $0x78] sm:$0xff]  ;;  %601 = vmatprep.subr.mxu0 %v294_v0  ;;  %v277_v3 = vld [vmem:[%s1024_s1 + $0x70] sm:$0xff]  ;;  %v276_v5 = vld [vmem:[%s1024_s1 + $0x68] sm:$0xff]  ;;  %470 = vmatprep.mubr.f32.mxu1 %v738_v50 }
  0x15   : > { %602 = vmatpush3.msra.mxu0 %v278_v1  ;;  %v291_v6 = vld [vmem:[%s1024_s1 + $0xe0] sm:$0xff]  ;;  %s599_s9 = sshll.u32 %s840_s19, 4  ;;  %v290_v8 = vld [vmem:[%s1024_s1 + $0xd8] sm:$0xff]  ;;  %v289_v10 = vld [vmem:[%s1024_s1 + $0xd0] sm:$0xff]  ;;  %s591_s17 = sshll.u32 %s840_s19, 3  ;;  %v394_v58 = vshrl.u32 %v393_v57, 7 }
  0x16   : > { %603 = vmatprep.subr.mxu0 %v293_v2  ;;  %v275_v7 = vld [vmem:[%s1024_s1 + $0x60] sm:$0xff]  ;;  %v274_v9 = vld [vmem:[%s1024_s1 + $0x58] sm:$0xff]  ;;  %s861_s18 = scalar_lea.vmem %s1023_s0, %s599_s9  ;;  %v273_v11 = vld [vmem:[%s1024_s1 + $0x50] sm:$0xff]  ;;  %s260_s26 = scalar_lea.vmem %s1029_s6, %s591_s17 }
  0x17   : > { %604 = vmatpush3.msra.mxu0 %v277_v3  ;;  %v288_v12 = vld [vmem:[%s1024_s1 + $0xc8] sm:$0xff]  ;;  %v390_v15 = vld [vmem:[%s1026_s3 + $0x78] sm:$0xff]  ;;  %v389_v16 = vld [vmem:[%s1026_s3 + $0x70] sm:$0xff]  ;;  %v395_v59 = vsub.s32 0, %v394_v58  ;;  %v399_v61 = vsub.s32 1, %v394_v58  ;;  %s600_s19 = sshll.u32 %s796_s25, 8 }
  0x18   : > { %605 = vmatprep.subr.mxu0 %v292_v4  ;;  %v262_v13 = vld [vmem:[%s861_s18 + $0x8] sm:$0xff]  ;;  %v287_v17 = vld [vmem:[%s1024_s1 + $0xc0] sm:$0xff]  ;;  %422 = vmatprep.subr.mxu1 %v390_v15  ;;  %v386_v21 = vld [vmem:[%s1026_s3 + $0x58] sm:$0xff]  ;;  %s245_s9 = scalar_lea.vmem [#allocation2], %s588_s29  ;;  %s496_s15 = scalar_lea.hbm %s1028_s5, %s600_s19 }
  0x19   : > { %606 = vmatpush3.msra.mxu0 %v276_v5  ;;  %v272_v14 = vld [vmem:[%s1024_s1 + $0x48] sm:$0xff]  ;;  %366 = vmatprep.mubr.f32.mxu0 %v262_v13  ;;  %v387_v19 = vld [vmem:[%s1026_s3 + $0x60] sm:$0xff]  ;;  %v286_v22 = vld [vmem:[%s1024_s1 + $0xb8] sm:$0xff]  ;;  %s498_s12 = sshll.u32 %s245_s9, 4  ;;  %s499_s12 = int_to_ptr.vmem [resolvable:$true] %s498_s12 }
  0x1a   : > { %607 = vmatprep.subr.mxu0 %v291_v6  ;;  %v388_v18 = vld [vmem:[%s1026_s3 + $0x68] sm:$0xff]  ;;  %v271_v20 = vld [vmem:[%s1024_s1 + $0x40] sm:$0xff]  ;;  %423 = vmatpush1.msra.mxu1 %v389_v16  ;;  %v385_v23 = vld [vmem:[%s1026_s3 + $0x50] sm:$0xff]  ;;  %s676_s17 = scalar_lea.vmem %s499_s12, 256 }
  0x1b   : > { %608 = vmatpush3.msra.mxu0 %v275_v7  ;;  %424 = vmatprep.subr.mxu1 %v388_v18  ;;  %v270_v24 = vld [vmem:[%s1024_s1 + $0x38] sm:$0xff]  ;;  %v384_v25 = vld [vmem:[%s1026_s3 + $0x48] sm:$0xff]  ;;  %v285_v26 = vld [vmem:[%s1024_s1 + $0xb0] sm:$0xff]  ;;  %p677_p11 = scmp.ne.s32.totalorder %s499_s12, %s676_s17 }
  0x1c   : > { %609 = vmatprep.subr.mxu0 %v290_v8  ;;  %425 = vmatpush1.msra.mxu1 %v387_v19  ;;  %v269_v27 = vld [vmem:[%s1024_s1 + $0x30] sm:$0xff]  ;;  %v284_v28 = vld [vmem:[%s1024_s1 + $0xa8] sm:$0xff]  ;;  %v283_v30 = vld [vmem:[%s1024_s1 + $0xa0] sm:$0xff] }
  0x1d   : > { %610 = vmatpush3.msra.mxu0 %v274_v9  ;;  %426 = vmatprep.subr.mxu1 %v386_v21  ;;  %v268_v29 = vld [vmem:[%s1024_s1 + $0x28] sm:$0xff]  ;;  %v267_v31 = vld [vmem:[%s1024_s1 + $0x20] sm:$0xff]  ;;  %v282_v32 = vld [vmem:[%s1024_s1 + $0x98] sm:$0xff]  ;;  %p678_p12 = pnand %p677_p11, %p813_p5 }
  0x1e   : > { %611 = vmatprep.subr.mxu0 %v289_v10  ;;  %427 = vmatpush1.msra.mxu1 %v385_v23  ;;  %v266_v33 = vld [vmem:[%s1024_s1 + $0x18] sm:$0xff]  ;;  %v281_v34 = vld [vmem:[%s1024_s1 + $0x90] sm:$0xff]  ;;  %v280_v36 = vld [vmem:[%s1024_s1 + $0x88] sm:$0xff] }
  0x1f   : > { %612 = vmatpush3.msra.mxu0 %v273_v11  ;;  %428 = vmatprep.subr.mxu1 %v384_v25  ;;  %v265_v35 = vld [vmem:[%s1024_s1 + $0x10] sm:$0xff]  ;;  %v264_v37 = vld [vmem:[%s1024_s1 + $0x8] sm:$0xff]  ;;  %v279_v38 = vld [vmem:[%s1024_s1 + $0x80] sm:$0xff]  ;;  %p679_p13 = pneg %p678_p12 }
  0x20   : > { %613 = vmatprep.subr.mxu0 %v288_v12  ;;  %v263_v39 = vld [vmem:[%s1024_s1] sm:$0xff]  ;;  %v382_v42 = vld [vmem:[%s1026_s3 + $0x38] sm:$0xff]  ;;  %v381_v43 = vld [vmem:[%s1026_s3 + $0x30] sm:$0xff] }
  0x21   : > { %614 = vmatpush3.msra.mxu0 %v272_v14  ;;  %v261_v40 = vld [vmem:[%s861_s18] sm:$0xff]  ;;  %v380_v44 = vld [vmem:[%s1026_s3 + $0x28] sm:$0xff]  ;;  %v378_v46 = vld [vmem:[%s1026_s3 + $0x18] sm:$0xff]  ;;  %s739_s18 = smov [#allocation2]  }
  0x22   : > { %615 = vmatprep.subr.mxu0 %v287_v17  ;;  %v383_v41 = vld [vmem:[%s1026_s3 + $0x40] sm:$0xff]  ;;  %v377_v47 = vld [vmem:[%s1026_s3 + $0x10] sm:$0xff]  ;;  %v376_v48 = vld [vmem:[%s1026_s3 + $0x8] sm:$0xff]  ;;  %s680_s25 = sshll.u32 %s739_s18, 4  ;;  %s681_s25 = int_to_ptr.vmem [resolvable:$false] %s680_s25 }
  0x23   : > { %616 = vmatpush3.msra.mxu0 %v271_v20  ;;  %429 = vmatpush1.msra.mxu1 %v383_v41  ;;  %v379_v45 = vld [vmem:[%s1026_s3 + $0x20] sm:$0xff]  ;;  %s682_s20 = scalar_lea.vmem %s681_s25, 512  ;;  %p683_p0 = scmp.lt.s32.totalorder %s499_s12, %s681_s25 }
  0x24   : > { %617 = vmatprep.subr.mxu0 %v286_v22  ;;  %430 = vmatprep.subr.mxu1 %v382_v42  ;;  %v375_v49 = vld [vmem:[%s1026_s3] sm:$0xff]  ;;  %p684_p1 = scmp.lt.s32.totalorder %s682_s20, %s676_s17 }
  0x25   : > { %618 = vmatpush3.msra.mxu0 %v270_v24  ;;  %431 = vmatpush1.msra.mxu1 %v381_v43  ;;  %v592_v52 = vld [vmem:[%s1025_s2] ss:$0 sm:$0xff] }
  0x26   : > { %619 = vmatprep.subr.mxu0 %v285_v26  ;;  %432 = vmatprep.subr.mxu1 %v380_v44  ;;  %v391_v60 = vld [vmem:[%s1027_s4] sm:$0x3]  ;;  %p685_p2 = por %p684_p1, %p683_p0 }
  0x27   : > { %620 = vmatpush3.msra.mxu0 %v269_v27  ;;  %433 = vmatpush1.msra.mxu1 %v379_v45  ;;  %v396_v62 = vrot.slane %v391_v60, %v395_v59  ;;  %v400_v63 = vrot.slane %v391_v60, %v399_v61 }
  0x28   : > { %621 = vmatprep.subr.mxu0 %v284_v28  ;;  %434 = vmatprep.subr.mxu1 %v378_v46  ;;  %p686_p3 = pnand %p685_p2, %p679_p13 }
  0x29   : > { %622 = vmatpush3.msra.mxu0 %v268_v29  ;;  %435 = vmatpush1.msra.mxu1 %v377_v47 }
  0x2a   : > { %623 = vmatprep.subr.mxu0 %v283_v30  ;;  %436 = vmatprep.subr.mxu1 %v376_v48 }
  0x2b   : > { %624 = vmatpush3.msra.mxu0 %v267_v31  ;;  %437 = vmatpush1.msra.mxu1 %v375_v49 }
  0x2c   : > { %625 = vmatprep.subr.mxu0 %v282_v32 }
  0x2d   : > { %626 = vmatpush3.msra.mxu0 %v266_v33 }
  0x2e   : > { %627 = vmatprep.subr.mxu0 %v281_v34 }
  0x2f   : > { %628 = vmatpush3.msra.mxu0 %v265_v35 }
  0x30   : > { %629 = vmatprep.subr.mxu0 %v280_v36 }
  0x31   : > { %630 = vmatpush3.msra.mxu0 %v264_v37 }
  0x32   : > { %631 = vmatprep.subr.mxu0 %v279_v38 }
  0x33   : > { %632 = vmatpush3.msra.mxu0 %v263_v39 }
  0x34   : > { %367 = vmatmul.mubr.f32.vlgmr.msra.gmra.mxu0 %v261_v40 }
  0xf4   : > { %v633_v51 = vpop.f32.mrf.mxu0 }
  0xf6   : > { %v634_v53 = vpop.f32.mrf.mxu0 }
  0xf7   : > { %v635_v54 = vadd.f32 %v634_v53, %v633_v51 }
  0xf9   : > { %v369_v55 = vadd.f32 %v635_v54, %v592_v52 }
  0xfb   : > { %v372_v56 = vmax.f32 %v369_v55, 0.0 }
  0xfd   : > { %374 = vst.msk [vmem:[%s260_s26] sm:$0xff] %vm373_vm0, %v372_v56  ;;  %593 = vmatmul.mubr.msk.f32.vlgmr.msra.gmra.mxu1 %vm373_vm0, %v372_v56 }
 0x1bd   : > { %v472_v0 = vpop.f32.mrf.mxu1 }
 0x1be   : > { %v473_v1 = vadd.f32 %v472_v0, %v396_v62 }
 0x1bf   : > { %v474_v2 = vpop.f32.mrf.mxu1 }
 0x1c0   : > { %477 = vst [vmem:[%s245_s9] sm:$0xff] %v473_v1  ;;  %v475_v3 = vadd.f32 %v474_v2, %v400_v63 }
 0x1c2   : > { %478 = vst [vmem:[%s245_s9 + $0x8] sm:$0xff] %v475_v3 }
 0x1c3   : > { %689 = shalt.err (!%p686_p3)
}
 0x1c4   : > { %s690_s26 = scalar_lea.hbm %s496_s15, 256  ;;  %s694_s10 = scalar_lea.hbm %s1028_s5, 512 }
 0x1c5   : > { %p691_p4 = scmp.ne.s32.totalorder %s496_s15, %s690_s26  ;;  %p695_p9 = scmp.lt.s32.totalorder %s496_s15, %s1028_s5 }
 0x1c6   : > { %p696_p10 = scmp.lt.s32.totalorder %s694_s10, %s690_s26 }
 0x1c7   : > { %p692_p7 = pnand %p691_p4, %p813_p5 }
 0x1c8   : > { %p697_p11 = por %p696_p10, %p695_p9 }
 0x1c9   : > { %p693_p8 = pneg %p692_p7 }
 0x1cb   : > { %p698_p12 = pnand %p697_p11, %p693_p8 }
 0x1cd   : > { %701 = shalt.err (!%p698_p12)
}
 0x1ce   : > { %636 = dma.vmem_to_hbm [thread:$0]  (%p813_p5), %s499_s12, 256, %s496_s15, %s480_s16  }
 0x1cf PF: > { %p642_p13 = scmp.ge.s32.totalorder %s736_s24, 2  ;;  %s513_s9 = sand.u32 1, %s724_s21  }
 0x1d0   : > { %s514_s13 = scalar_lea.sflag [#allocation3], %s513_s9 }
 0x1d1   : > { %p639_p0 = pnand %p642_p13, %p817_p6 }
 0x1d3   : > { %p640_p1 = pneg %p639_p0 }
 0x1d5   : > { %719 = dma.done.wait (%p640_p1), %s514_s13, 256  }
 0x1d6   : > { %721 = vsyncadd (%p640_p1), %s514_s13, 4294967040  ;;  %p17_p2 = scmp.ge.s32.totalorder %s800_s27, 4   ;;  %s1032_s21 = smov %s728_s22 }
 0x1d7   : > { %s1033_s22 = smov %s732_s23  ;;  %s1034_s23 = smov %s811_s30 }
 0x1d8   : > { %s1035_s24 = smov %s800_s27  ;;  %19 = sbr.rel (!%p17_p2) target bundleno = 3 (0x3), region = 87 }
 0x1dd   :  { %526 = vsyncpa [#allocation3], 1 }
 0x1de   :  { %528 = vsyncpa [#allocation3 + $0x1], 1 }

</bundles_post_ra>
